<compile_context>
chip_gen: v7x
topology: tpu7x:2x2x1
jax: 0.10.0
libtpu: 0.0.40
codegen_flags: <defaults>
</compile_context>

<pallas_src>
import functools

import jax
import jax.numpy as jnp
from jax.experimental import pallas as pl
from jax.experimental.pallas import tpu as pltpu

_N_PAD = 128  # lane-dense padded out-feature count (true out features = 16)


def _round_up(x, m):
    return ((x + m - 1) // m) * m


def _fc_decoder_kernel(x_ref, w1_ref, b1_ref, w2_ref, b2_ref, o_ref):
    # x_ref : (TM, D)      bf16 activation tile
    # w1_ref: (D, D)       bf16 embed weight (in, out), resident across grid
    # b1_ref: (1, D)       f32 embed bias
    # w2_ref: (D, 128)     bf16 fc weight, zero-padded 16 -> 128 out features
    # b2_ref: (1, 128)     f32 fc bias, zero-padded
    # o_ref : (TM, 128)    f32 logits tile (lane-dense store)
    x = x_ref[...]
    h = jnp.dot(x, w1_ref[...], preferred_element_type=jnp.float32)
    h = jnp.maximum(h + b1_ref[...], 0.0)              # bias + relu in f32
    h = h.astype(w2_ref.dtype)                          # bf16 for 2nd MXU pass
    out = jnp.dot(h, w2_ref[...], preferred_element_type=jnp.float32)
    out = out + b2_ref[...]
    o_ref[...] = out.astype(o_ref.dtype)


@functools.partial(jax.jit, static_argnames=("model_size", "block_m"))
def fc_decoder_forward(inputs, w_embed, b_embed, w_fc, b_fc, *,
                       model_size, block_m=512):
    """Pallas implementation of FCDecoder.forward.

    inputs: (B, S, model_size) float32
    returns logits: (B, S, 16) float32
    """
    B = inputs.shape[0]
    D = model_size
    x = inputs.reshape(-1, D)                       # == inputs.view(-1, self.size)
    M = x.shape[0]

    # ---- tile sizes / padding -------------------------------------------
    TM = min(block_m, _round_up(M, 8))              # multiple of 8 (f32/bf16 ok)
    M_pad = _round_up(M, TM)
    grid_m = M_pad // TM

    x_pad = x
    if M_pad != M:
        x_pad = jnp.pad(x, ((0, M_pad - M), (0, 0)))

    # bf16 operands for the MXU; biases stay f32.
    xb = x_pad.astype(jnp.bfloat16)
    w1 = w_embed.astype(jnp.bfloat16)

    # Lane-dense second matmul: pad out features 16 -> 128 with zeros.
    w2p = jnp.zeros((D, _N_PAD), jnp.float32).at[:, :16].set(w_fc)
    w2p = w2p.astype(jnp.bfloat16)
    b1 = b_embed.reshape(1, D).astype(jnp.float32)
    b2p = jnp.zeros((1, _N_PAD), jnp.float32).at[:, :16].set(b_fc.reshape(1, 16))

    # ---- VMEM budget (double-buffered x/out + resident weights) ----------
    vmem_bytes = (
        2 * (TM * D * 2 + TM * _N_PAD * 4)          # x (bf16) + out (f32), 2 bufs
        + 2 * (D * D * 2 + D * _N_PAD * 2)          # W1 + W2 (bf16), 2 bufs
        + 2 * (D * 4 + _N_PAD * 4)                  # biases (f32)
    )
    vmem_limit = int(min(max(2 * vmem_bytes, 8 * 1024 * 1024), 48 * 1024 * 1024))

    cost = pl.CostEstimate(
        flops=2 * M_pad * D * (D + _N_PAD),
        transcendentals=0,
        bytes_accessed=(M_pad * D * 2 + D * D * 2 + D * _N_PAD * 2
                        + D * 4 + _N_PAD * 4 + M_pad * _N_PAD * 4),
    )

    out = pl.pallas_call(
        _fc_decoder_kernel,
        out_shape=jax.ShapeDtypeStruct((M_pad, _N_PAD), jnp.float32),
        grid_spec=pltpu.PrefetchScalarGridSpec(
            num_scalar_prefetch=0,
            grid=(grid_m,),
            in_specs=[
                pl.BlockSpec((TM, D), lambda i: (i, 0)),       # x tile moves
                pl.BlockSpec((D, D), lambda i: (0, 0)),        # W1 resident
                pl.BlockSpec((1, D), lambda i: (0, 0)),        # b1 resident
                pl.BlockSpec((D, _N_PAD), lambda i: (0, 0)),   # W2 resident
                pl.BlockSpec((1, _N_PAD), lambda i: (0, 0)),   # b2 resident
            ],
            out_specs=pl.BlockSpec((TM, _N_PAD), lambda i: (i, 0)),
        ),
        compiler_params=pltpu.CompilerParams(
            dimension_semantics=("parallel",),
            vmem_limit_bytes=vmem_limit,
        ),
        cost_estimate=cost,
    )(xb, w1, b1, w2p, b2p)

    # Strip row padding and the lane padding, then .view(inputs.size(0), -1, 16)
    return out[:M, :16].reshape(B, -1, 16)


def init_params(key, model_size):
    """Deterministic synthetic parameters (PyTorch-Linear shaped, stored (in, out))."""
    k1, k2, k3, k4 = jax.random.split(key, 4)
    bound1 = 1.0 / jnp.sqrt(model_size)
    w_embed = jax.random.uniform(k1, (model_size, model_size), jnp.float32,
                                 -bound1, bound1)
    b_embed = jax.random.uniform(k2, (model_size,), jnp.float32, -bound1, bound1)
    w_fc = jax.random.uniform(k3, (model_size, 16), jnp.float32, -bound1, bound1)
    b_fc = jax.random.uniform(k4, (16,), jnp.float32, -bound1, bound1)
    return w_embed, b_embed, w_fc, b_fc


if __name__ == "__main__":
    model_size = 32
    B, S = 2, 8

    key = jax.random.PRNGKey(0)
    k_x, k_p = jax.random.split(key)
    inputs = jax.random.normal(k_x, (B, S, model_size), dtype=jnp.float32)
    w_embed, b_embed, w_fc, b_fc = init_params(k_p, model_size)

    logits = fc_decoder_forward(inputs, w_embed, b_embed, w_fc, b_fc,
                                model_size=model_size)
    logits = jax.block_until_ready(logits)
    assert logits.shape == (B, S, 16)

    # Reference 1: same bf16-operand / f32-accumulate math in plain JAX.
    x = inputs.reshape(-1, model_size)
    h_ref = jnp.maximum(
        jnp.dot(x.astype(jnp.bfloat16), w_embed.astype(jnp.bfloat16),
                preferred_element_type=jnp.float32) + b_embed, 0.0)
    ref_bf16 = (jnp.dot(h_ref.astype(jnp.bfloat16), w_fc.astype(jnp.bfloat16),
                        preferred_element_type=jnp.float32)
                + b_fc).reshape(B, -1, 16)
    assert jnp.allclose(logits, ref_bf16, atol=2e-3, rtol=2e-3)

    # Reference 2: full-f32 math (loose tolerance covers bf16 operand rounding).
    ref_f32 = (jnp.maximum(x @ w_embed + b_embed, 0.0) @ w_fc + b_fc).reshape(B, -1, 16)
    assert jnp.allclose(logits, ref_f32, atol=5e-2, rtol=5e-2)

    print("KERNEL_OK")
</pallas_src>

<mosaic_0001>
module attributes {stable_mosaic.version = 11 : i64} {
  func.func @_fc_decoder_kernel(%arg0: i32, %arg1: memref<16x32xbf16, #tpu.memory_space<vmem>>, %arg2: memref<32x32xbf16, #tpu.memory_space<vmem>>, %arg3: memref<1x32xf32, #tpu.memory_space<vmem>>, %arg4: memref<32x128xbf16, #tpu.memory_space<vmem>>, %arg5: memref<1x128xf32, #tpu.memory_space<vmem>>, %arg6: memref<16x128xf32, #tpu.memory_space<vmem>>) attributes {dimension_semantics = [#tpu.dimension_semantics<parallel>], iteration_bounds = array<i64: 1>, scalar_prefetch = 0 : i64, scratch_operands = 0 : i64, tpu.core_type = #tpu.core_type<tc>, window_params = [{transform_indices = @transform_0, window_bounds = array<i64: 16, 32>}, {pipeline_mode = #tpu.pipeline_mode<synchronous>, transform_indices = @transform_1, window_bounds = array<i64: 32, 32>}, {pipeline_mode = #tpu.pipeline_mode<synchronous>, transform_indices = @transform_2, window_bounds = array<i64: 1, 32>}, {pipeline_mode = #tpu.pipeline_mode<synchronous>, transform_indices = @transform_3, window_bounds = array<i64: 32, 128>}, {pipeline_mode = #tpu.pipeline_mode<synchronous>, transform_indices = @transform_4, window_bounds = array<i64: 1, 128>}, {transform_indices = @transform_5, window_bounds = array<i64: 16, 128>}]} {
    %c0 = arith.constant 0 : index
    %c0_0 = arith.constant 0 : index
    %0 = vector.load %arg1[%c0, %c0_0] : memref<16x32xbf16, #tpu.memory_space<vmem>>, vector<16x32xbf16>
    %c0_1 = arith.constant 0 : index
    %c0_2 = arith.constant 0 : index
    %1 = vector.load %arg2[%c0_1, %c0_2] : memref<32x32xbf16, #tpu.memory_space<vmem>>, vector<32x32xbf16>
    %cst = arith.constant dense<0.000000e+00> : vector<16x32xf32>
    %2 = tpu.matmul %0, %1, %cst {dimension_numbers = #tpu.dot_dimension_numbers<[1], [0], [0], [1], [0, 0, 1, 1], [], []>} : vector<16x32xbf16>, vector<32x32xbf16>, vector<16x32xf32> -> vector<16x32xf32>
    %c0_3 = arith.constant 0 : index
    %c0_4 = arith.constant 0 : index
    %3 = vector.load %arg3[%c0_3, %c0_4] : memref<1x32xf32, #tpu.memory_space<vmem>>, vector<1x32xf32>
    %4 = vector.broadcast %3 : vector<1x32xf32> to vector<16x32xf32>
    %5 = arith.addf %2, %4 : vector<16x32xf32>
    %cst_5 = arith.constant 0.000000e+00 : f32
    %6 = vector.broadcast %cst_5 : f32 to vector<16x32xf32>
    %7 = arith.maximumf %5, %6 : vector<16x32xf32>
    %8 = arith.truncf %7 : vector<16x32xf32> to vector<16x32xbf16>
    %c0_6 = arith.constant 0 : index
    %c0_7 = arith.constant 0 : index
    %9 = vector.load %arg4[%c0_6, %c0_7] : memref<32x128xbf16, #tpu.memory_space<vmem>>, vector<32x128xbf16>
    %cst_8 = arith.constant dense<0.000000e+00> : vector<16x128xf32>
    %10 = tpu.matmul %8, %9, %cst_8 {dimension_numbers = #tpu.dot_dimension_numbers<[1], [0], [0], [1], [0, 0, 1, 1], [], []>} : vector<16x32xbf16>, vector<32x128xbf16>, vector<16x128xf32> -> vector<16x128xf32>
    %c0_9 = arith.constant 0 : index
    %c0_10 = arith.constant 0 : index
    %11 = vector.load %arg5[%c0_9, %c0_10] : memref<1x128xf32, #tpu.memory_space<vmem>>, vector<1x128xf32>
    %12 = vector.broadcast %11 : vector<1x128xf32> to vector<16x128xf32>
    %13 = arith.addf %10, %12 : vector<16x128xf32>
    %c0_11 = arith.constant 0 : index
    %c0_12 = arith.constant 0 : index
    %14 = vector.load %arg6[%c0_11, %c0_12] : memref<16x128xf32, #tpu.memory_space<vmem>>, vector<16x128xf32>
    tpu.vector_store %arg6[%c0_11, %c0_12], %13 {strides = array<i32>} : memref<16x128xf32, #tpu.memory_space<vmem>>, vector<16x128xf32>,
    return
  }
  func.func @transform_0(%arg0: i32) -> (i32, i32) {
    %c0_i32 = arith.constant 0 : i32
    %c0_i32_0 = arith.constant 0 : i32
    return %arg0, %c0_i32 : i32, i32
  }
  func.func @transform_1(%arg0: i32) -> (i32, i32) {
    %c0_i32 = arith.constant 0 : i32
    %c0_i32_0 = arith.constant 0 : i32
    %c0_i32_1 = arith.constant 0 : i32
    return %c0_i32, %c0_i32_0 : i32, i32
  }
  func.func @transform_2(%arg0: i32) -> (i32, i32) {
    %c0_i32 = arith.constant 0 : i32
    %c0_i32_0 = arith.constant 0 : i32
    %c0_i32_1 = arith.constant 0 : i32
    return %c0_i32, %c0_i32_0 : i32, i32
  }
  func.func @transform_3(%arg0: i32) -> (i32, i32) {
    %c0_i32 = arith.constant 0 : i32
    %c0_i32_0 = arith.constant 0 : i32
    %c0_i32_1 = arith.constant 0 : i32
    return %c0_i32, %c0_i32_0 : i32, i32
  }
  func.func @transform_4(%arg0: i32) -> (i32, i32) {
    %c0_i32 = arith.constant 0 : i32
    %c0_i32_0 = arith.constant 0 : i32
    %c0_i32_1 = arith.constant 0 : i32
    return %c0_i32, %c0_i32_0 : i32, i32
  }
  func.func @transform_5(%arg0: i32) -> (i32, i32) {
    %c0_i32 = arith.constant 0 : i32
    %c0_i32_0 = arith.constant 0 : i32
    return %arg0, %c0_i32 : i32, i32
  }
}

</mosaic_0001>

<bundles_post_ra>
// kernel: fc_decoder_forward.1
= control target key start
LH: loop header
LB: loop body
LE: loop exit
PB: predicated region body
PF: predicated region fallthrough
CT: control target
= control target key end

     0   :  { %v210_v0 = vmov 0.0   ;;  %vm211_vm0 = vmmov 0   ;;  %vm51_vm1 = vcmask 261120   ;;  %s271_s1 = inlined_call_operand.vmem [shape: bf16[32,32], index: 1, kind: input, shape index: {}]   ;;  %s272_s0 = inlined_call_operand.vmem [shape: bf16[16,32], index: 0, kind: input, shape index: {}]   ;;  %s273_s3 = inlined_call_operand.vmem [shape: bf16[32,128], index: 3, kind: input, shape index: {}]   ;;  %s274_s2 = inlined_call_operand.vmem [shape: f32[1,32], index: 2, kind: input, shape index: {}]   ;;  %s275_s4 = inlined_call_operand.vmem [shape: f32[1,128], index: 4, kind: input, shape index: {}]   ;;  %s276_s5 = inlined_call_operand.vmem [shape: f32[16,128], index: 5, kind: output, shape index: {}]  }
   0x1   :  { %187 = vmatprep.subr.bf16.mxu0 %v210_v0  ;;  %v205_v1 = vld [vmem:[%s271_s1] sm:$0xff]   ;;  %191 = vmatprep.mubr.msk.bf16.mxu0 %vm211_vm0, %v210_v0  ;;  %v206_v2 = vld [vmem:[%s271_s1 + $0x8] sm:$0xff]  }
   0x2   :  { %195 = vmatprep.subr.bf16.mxu1 %v210_v0  ;;  %199 = vmatprep.mubr.msk.bf16.mxu1 %vm211_vm0, %v210_v0  ;;  %v207_v3 = vld [vmem:[%s272_s0] sm:$0xff]   ;;  %v209_v5 = vld [vmem:[%s273_s3 + $0x8] sm:$0xff]  }
   0x3   :  { %188 = vmatpush3.bf16.msra.mxu0 %v205_v1  ;;  %v208_v4 = vld [vmem:[%s273_s3] sm:$0xff]  }
   0x4   :  { %189 = vmatprep.subr.bf16.mxu0 %v210_v0  ;;  %196 = vmatpush3.bf16.msra.mxu1 %v208_v4  ;;  %v172_v6 = vld [vmem:[%s274_s2] ss:$0 sm:$0xff] }
   0x5   :  { %197 = vmatprep.subr.bf16.mxu1 %v210_v0  ;;  %v177_v16 = vld [vmem:[%s275_s4] ss:$0 sm:$0xff] }
   0x7   :  { %190 = vmatpush3.bf16.msra.mxu0 %v206_v2 }
   0x8   :  { %198 = vmatpush3.bf16.msra.mxu1 %v209_v5 }
   0xa   :  { %192 = vmatmul.mubr.msk.bf16.vlgmr.msra.gmra.mrb[0].mxu0 %vm51_vm1, %v207_v3 }
  0xdd   :  { %v89_v7 = vpop.f32.mrb[0].mxu0 }
  0xde   :  { %v90_v8 = vadd.f32 %v172_v6, %v89_v7  ;;  %v193_v9 = vpop.f32.mrb[1].mxu0 }
  0xdf   :  { %v92_v10 = vpop.f32.mrb[2].mxu0 }
  0xe0   :  { %v93_v11 = vadd.f32 %v172_v6, %v92_v10  ;;  %v194_v12 = vpop.f32.mrb[3].mxu0  ;;  %v96_v13 = vmax.f32 %v90_v8, 0.0 }
  0xe2   :  { %v97_v14 = vmax.f32 %v93_v11, 0.0 }
  0xe4   :  { %v98_v15 = vpack.c.bf16 %v97_v14, %v96_v13 }
  0xe6   :  { %200 = vmatmul.mubr.msk.bf16.vlgmr.msra.gmra.mrb[0].mxu1 %vm51_vm1, %v98_v15 }
 0x1b9   :  { %v159_v17 = vpop.f32.mrb[0].mxu1 }
 0x1ba   :  { %v160_v18 = vadd.f32 %v177_v16, %v159_v17  ;;  %v201_v19 = vpop.f32.mrb[1].mxu1 }
 0x1bb   :  { %v162_v20 = vpop.f32.mrb[2].mxu1 }
 0x1bc   :  { %166 = vst [vmem:[%s276_s5] sm:$0xff] %v160_v18  ;;  %v163_v21 = vadd.f32 %v177_v16, %v162_v20  ;;  %v202_v22 = vpop.f32.mrb[3].mxu1 }
 0x1be   :  { %167 = vst [vmem:[%s276_s5 + $0x8] sm:$0xff] %v163_v21 }

</bundles_post_ra>
